<compile_context>
chip_gen: v7x
topology: tpu7x:2x2x1
jax: 0.10.0
libtpu: 0.0.40
codegen_flags: <defaults>
</compile_context>

<pallas_src>
import numpy as np
import jax
import jax.numpy as jnp
from jax.experimental import pallas as pl
from jax.experimental.pallas import tpu as pltpu


def len_of_split_into_k_parts(L, k):
    if k <= 0:
        raise ValueError("k must be greater than 0")
    if L < k:
        raise ValueError("The iterable has fewer elements than k")
    avg, rem = L // k, L % k
    return [avg + (1 if i < rem else 0) for i in range(k)]


# ----------------------------- Pallas kernel ------------------------------ #

def _splitter_kernel(x_ref, w_ref, b_ref, out_ref):
    # x_ref  : [TN, T]    f32 VMEM   flattened (batch*channel) rows of the lookback
    # w_ref  : [T, K*D]   f32 VMEM   fused block-structured projection weight
    # b_ref  : [1, K*D]   f32 VMEM   fused bias
    # out_ref: [TN, K*D]  f32 VMEM   lane-dense final-layout output
    out_ref[...] = (
        jnp.dot(x_ref[...], w_ref[...], preferred_element_type=jnp.float32)
        + b_ref[...]
    )


# ------------------------------ wrapper ----------------------------------- #

def build_fused_weights(params, split_lengths, shared, d_model):
    """Fold all per-split (padded) Linear layers into [T, K*D] weight + [K*D] bias."""
    k = len(split_lengths)
    T = sum(split_lengths)
    w_all = np.zeros((T, k * d_model), dtype=np.float32)
    b_all = np.zeros((k * d_model,), dtype=np.float32)
    starts = np.cumsum([0] + split_lengths[:-1]).tolist()
    if shared:
        W = np.asarray(params["w"])      # [D, max_len]
        b = np.asarray(params["b"])      # [D]
        max_len = W.shape[1]
        for i, (s, l) in enumerate(zip(starts, split_lengths)):
            pad = max_len - l
            # left zero-padding => only the last l weight columns touch data
            w_all[s:s + l, i * d_model:(i + 1) * d_model] = W[:, pad:].T
            b_all[i * d_model:(i + 1) * d_model] = b
    else:
        for i, (s, l) in enumerate(zip(starts, split_lengths)):
            Wi = np.asarray(params["w"][i])   # [D, l_i]
            bi = np.asarray(params["b"][i])   # [D]
            w_all[s:s + l, i * d_model:(i + 1) * d_model] = Wi.T
            b_all[i * d_model:(i + 1) * d_model] = bi
    return jnp.asarray(w_all), jnp.asarray(b_all)


def splitter_forward(x, w_all, b_all, k, d_model, row_tile=512):
    """x: [B, C, T] float -> [B, C, K, D] float32."""
    B, C, T = x.shape
    N = B * C
    KD = k * d_model
    x_flat = x.reshape(N, T).astype(jnp.float32)

    # Row tile: multiple of 8 (sublane), capped so VMEM stays small and the
    # grid pipelines / shards across cores. Pad the tail (no dropped rows).
    TN = min(row_tile, 8 * pl.cdiv(N, 8))
    N_pad = TN * pl.cdiv(N, TN)
    if N_pad != N:
        x_flat = jnp.pad(x_flat, ((0, N_pad - N), (0, 0)))

    out = pl.pallas_call(
        _splitter_kernel,
        out_shape=jax.ShapeDtypeStruct((N_pad, KD), jnp.float32),
        grid=(N_pad // TN,),
        in_specs=[
            pl.BlockSpec((TN, T), lambda i: (i, 0)),
            pl.BlockSpec((T, KD), lambda i: (0, 0)),   # resident weight
            pl.BlockSpec((1, KD), lambda i: (0, 0)),   # resident bias
        ],
        out_specs=pl.BlockSpec((TN, KD), lambda i: (i, 0)),
        compiler_params=pltpu.CompilerParams(
            dimension_semantics=("parallel",),
        ),
    )(x_flat, w_all, b_all.reshape(1, KD))

    return out[:N].reshape(B, C, k, d_model)


# --------------------------- pure-JAX reference ---------------------------- #

def reference(x, params, split_lengths, shared, d_model):
    """Mirrors the PyTorch Splitter.forward semantics."""
    starts = np.cumsum([0] + split_lengths[:-1]).tolist()
    outs = []
    if shared:
        W, b = params["w"], params["b"]
        max_len = W.shape[1]
        for s, l in zip(starts, split_lengths):
            part = x[..., s:s + l]
            part = jnp.pad(part, ((0, 0), (0, 0), (max_len - l, 0)))  # left pad
            outs.append(part @ W.T + b)
    else:
        for i, (s, l) in enumerate(zip(starts, split_lengths)):
            part = x[..., s:s + l]
            outs.append(part @ params["w"][i].T + params["b"][i])
    return jnp.stack(outs, axis=2)   # [B, C, K, D]


# --------------------------------- main ------------------------------------ #

if __name__ == "__main__":
    d_model = 32
    lookback_horizon = 19          # splits into [7, 6, 6] -> exercises left padding
    number_of_splits = 3
    B, C = 2, 4

    key = jax.random.PRNGKey(0)
    kx, kw, kb, kws, kbs = jax.random.split(key, 5)

    split_lengths = len_of_split_into_k_parts(lookback_horizon, number_of_splits)
    max_len = int(np.max(split_lengths))

    x = jax.random.normal(kx, (B, C, lookback_horizon), jnp.float32)

    # shared=True: one Linear(max_len, d_model) with left zero-padding
    params_shared = dict(
        w=jax.random.normal(kw, (d_model, max_len), jnp.float32) / np.sqrt(max_len),
        b=jax.random.normal(kb, (d_model,), jnp.float32) * 0.1,
    )
    # shared=False: independent Linear(l_i, d_model) per split
    kws_list = jax.random.split(kws, number_of_splits)
    kbs_list = jax.random.split(kbs, number_of_splits)
    params_sep = dict(
        w=[jax.random.normal(kws_list[i], (d_model, l), jnp.float32) / np.sqrt(l)
           for i, l in enumerate(split_lengths)],
        b=[jax.random.normal(kbs_list[i], (d_model,), jnp.float32) * 0.1
           for i in range(number_of_splits)],
    )

    for shared, params in ((True, params_shared), (False, params_sep)):
        w_all, b_all = build_fused_weights(params, split_lengths, shared, d_model)
        out = splitter_forward(x, w_all, b_all, number_of_splits, d_model)
        out = jax.block_until_ready(out)
        ref = reference(x, params, split_lengths, shared, d_model)
        assert out.shape == (B, C, number_of_splits, d_model)
        assert jnp.allclose(out, ref, rtol=1e-2, atol=1e-2), f"mismatch (shared={shared})"

    print("KERNEL_OK")
</pallas_src>

<mosaic_0001>
module attributes {stable_mosaic.version = 11 : i64} {
  func.func @_splitter_kernel(%arg0: i32, %arg1: memref<8x19xf32, #tpu.memory_space<vmem>>, %arg2: memref<19x96xf32, #tpu.memory_space<vmem>>, %arg3: memref<1x96xf32, #tpu.memory_space<vmem>>, %arg4: memref<8x96xf32, #tpu.memory_space<vmem>>) attributes {dimension_semantics = [#tpu.dimension_semantics<parallel>], iteration_bounds = array<i64: 1>, scalar_prefetch = 0 : i64, scratch_operands = 0 : i64, tpu.core_type = #tpu.core_type<tc>, window_params = [{transform_indices = @transform_0, window_bounds = array<i64: 8, 19>}, {pipeline_mode = #tpu.pipeline_mode<synchronous>, transform_indices = @transform_1, window_bounds = array<i64: 19, 96>}, {pipeline_mode = #tpu.pipeline_mode<synchronous>, transform_indices = @transform_2, window_bounds = array<i64: 1, 96>}, {transform_indices = @transform_3, window_bounds = array<i64: 8, 96>}]} {
    %c0 = arith.constant 0 : index
    %c0_0 = arith.constant 0 : index
    %0 = vector.load %arg1[%c0, %c0_0] : memref<8x19xf32, #tpu.memory_space<vmem>>, vector<8x19xf32>
    %c0_1 = arith.constant 0 : index
    %c0_2 = arith.constant 0 : index
    %1 = vector.load %arg2[%c0_1, %c0_2] : memref<19x96xf32, #tpu.memory_space<vmem>>, vector<19x96xf32>
    %cst = arith.constant dense<0.000000e+00> : vector<8x96xf32>
    %2 = tpu.matmul %0, %1, %cst {dimension_numbers = #tpu.dot_dimension_numbers<[1], [0], [0], [1], [0, 0, 1, 1], [], []>} : vector<8x19xf32>, vector<19x96xf32>, vector<8x96xf32> -> vector<8x96xf32>
    %c0_3 = arith.constant 0 : index
    %c0_4 = arith.constant 0 : index
    %3 = vector.load %arg3[%c0_3, %c0_4] : memref<1x96xf32, #tpu.memory_space<vmem>>, vector<1x96xf32>
    %4 = vector.broadcast %3 : vector<1x96xf32> to vector<8x96xf32>
    %5 = arith.addf %2, %4 : vector<8x96xf32>
    %c0_5 = arith.constant 0 : index
    %c0_6 = arith.constant 0 : index
    %6 = vector.load %arg4[%c0_5, %c0_6] : memref<8x96xf32, #tpu.memory_space<vmem>>, vector<8x96xf32>
    tpu.vector_store %arg4[%c0_5, %c0_6], %5 {strides = array<i32>} : memref<8x96xf32, #tpu.memory_space<vmem>>, vector<8x96xf32>,
    return
  }
  func.func @transform_0(%arg0: i32) -> (i32, i32) {
    %c0_i32 = arith.constant 0 : i32
    %c0_i32_0 = arith.constant 0 : i32
    return %arg0, %c0_i32 : i32, i32
  }
  func.func @transform_1(%arg0: i32) -> (i32, i32) {
    %c0_i32 = arith.constant 0 : i32
    %c0_i32_0 = arith.constant 0 : i32
    %c0_i32_1 = arith.constant 0 : i32
    return %c0_i32, %c0_i32_0 : i32, i32
  }
  func.func @transform_2(%arg0: i32) -> (i32, i32) {
    %c0_i32 = arith.constant 0 : i32
    %c0_i32_0 = arith.constant 0 : i32
    %c0_i32_1 = arith.constant 0 : i32
    return %c0_i32, %c0_i32_0 : i32, i32
  }
  func.func @transform_3(%arg0: i32) -> (i32, i32) {
    %c0_i32 = arith.constant 0 : i32
    %c0_i32_0 = arith.constant 0 : i32
    return %arg0, %c0_i32 : i32, i32
  }
}

</mosaic_0001>

<bundles_post_ra>
// kernel: tpu_custom_call.1
= control target key start
LH: loop header
LB: loop body
LE: loop exit
PB: predicated region body
PF: predicated region fallthrough
CT: control target
= control target key end

     0   :  { %8 = vsyncpa [#allocation3], 0  ;;  %s321_s0 = inlined_call_operand.hbm [shape: f32[8,19], index: 0, kind: input, shape index: {}]   ;;  %s322_s1 = inlined_call_operand.hbm [shape: f32[19,96], index: 1, kind: input, shape index: {}]   ;;  %s323_s2 = inlined_call_operand.vmem [shape: f32[1,96], index: 2, kind: input, shape index: {}]   ;;  %s324_s3 = inlined_call_operand.hbm [shape: f32[8,96], index: 3, kind: output, shape index: {}]  }
   0x1   :  { %9 = vsyncpa [#allocation6], 0 }
   0x2   :  { %10 = vsyncpa [#allocation4], 0  ;;  %s247_s12 = smov [#allocation2]   ;;  %s248_s14 = smov [#allocation5]  }
   0x3   :  { %s17_s13 = sshll.u32 %s247_s12, 4  ;;  %s26_s15 = sshll.u32 %s248_s14, 4  ;;  %s18_s13 = int_to_ptr.vmem [resolvable:$true] %s17_s13  ;;  %s275_s15 = int_to_ptr.vmem [resolvable:$true] %s26_s15 }
   0x4   :  { %s175_s18 = scalar_lea.hbm %s321_s0, 128 }
   0x5   :  { %p176_p0 = scmp.ne.s32.totalorder %s321_s0, %s175_s18  ;;  %p179_p1 = scmp.lt.u32.totalorder %s175_s18, %s321_s0 }
   0x7   :  { %p181_p2 = pnand %p179_p1, %p176_p0 }
   0x9   :  { %184 = shalt.err (!%p181_p2)
}
   0xa   :  { %s185_s23 = scalar_lea.vmem %s18_s13, 128  ;;  %p190_p4 = scmp.lt.s32.totalorder %s18_s13, %s18_s13 }
   0xb   :  { %p186_p3 = scmp.ne.s32.totalorder %s18_s13, %s185_s23  ;;  %p191_p5 = scmp.lt.s32.totalorder %s185_s23, %s185_s23 }
   0xd   :  { %p192_p6 = por %p191_p5, %p190_p4 }
   0xf   :  { %p193_p7 = pnand %p192_p6, %p186_p3 }
  0x11   :  { %196 = shalt.err (!%p193_p7)
}
  0x12   :  { %20 = dma.hbm_to_vmem [thread:$0]  %s321_s0, 128, %s18_s13, [#allocation3]  }
  0x13   :  { %s197_s28 = scalar_lea.hbm %s322_s1, 384 }
  0x14   :  { %p198_p8 = scmp.ne.s32.totalorder %s322_s1, %s197_s28  ;;  %p201_p9 = scmp.lt.u32.totalorder %s197_s28, %s322_s1 }
  0x16   :  { %p203_p10 = pnand %p201_p9, %p198_p8 }
  0x18   :  { %206 = shalt.err (!%p203_p10)
}
  0x19   :  { %s207_s6 = scalar_lea.vmem %s275_s15, 384  ;;  %p212_p12 = scmp.lt.s32.totalorder %s275_s15, %s275_s15 }
  0x1a   :  { %p208_p11 = scmp.ne.s32.totalorder %s275_s15, %s207_s6  ;;  %p213_p13 = scmp.lt.s32.totalorder %s207_s6, %s207_s6 }
  0x1c   :  { %p214_p0 = por %p213_p13, %p212_p12 }
  0x1e   :  { %p215_p1 = pnand %p214_p0, %p208_p11 }
  0x20   :  { %218 = shalt.err (!%p215_p1)
}
  0x21   :  { %s249_s0 = smov 128   ;;  %s250_s7 = smov 8  }
  0x22   :  { %32 = dma.hbm_to_vmem [thread:$0]  %s322_s1, 384, %s275_s15, [#allocation6], %s249_s0, %s249_s0, %s250_s7  }
  0x23   :  { %241 = dma.done.wait [#allocation3], 128  }
  0x24   :  { %242 = vsyncadd [#allocation3], 4294967168 }
  0x25   :  { %243 = dma.done.wait [#allocation6], 384  }
  0x26   :  { %244 = vsyncadd [#allocation6], 4294966912  ;;  %v251_v0 = vmov 0.0|0.0   ;;  %vm252_vm0 = vmmov 0   ;;  %v253_v1 = vmov 0.0   ;;  %v42_v2 = vld [vmem:[#allocation5] sm:$0xff] }
  0x27   :  { %164 = vmatprep.subr.bf16.mxu0 %v251_v0  ;;  %161 = vmatprep.mubr.msk.f32.mxu0 %vm252_vm0, %v253_v1  ;;  %v43_v3 = vld [vmem:[#allocation5 + $0x8] sm:$0xff]  ;;  %v44_v5 = vld [vmem:[#allocation5 + $0x10] sm:$0x7]  ;;  %vm56_vm1 = vcmask 1042432   ;;  %v41_v6 = vld [vmem:[#allocation2] sm:$0xff]  ;;  %vm52_vm2 = vcmask 154624  }
  0x28   :  { %v165_v4 = vpack.c.bf16 %v43_v3, %v42_v2  ;;  %v148_v7 = vld [vmem:[%s323_s2] ss:$0 sm:$0xff]  ;;  %s254_s11 = smov [#allocation7]   ;;  %vm130_vm3 = vcmask 785408  }
  0x29   :  { %s138_s12 = sshll.u32 %s254_s11, 4  ;;  %s139_s12 = int_to_ptr.vmem [resolvable:$true] %s138_s12 }
  0x2a   :  { %166 = vmatpush3.bf16.msra.mxu0 %v165_v4  ;;  %s219_s13 = scalar_lea.vmem %s139_s12, 128  ;;  %p224_p3 = scmp.lt.s32.totalorder %s139_s12, %s139_s12 }
  0x2b   :  { %159 = vmatprep.subr.mxu0 %v253_v1  ;;  %p220_p2 = scmp.ne.s32.totalorder %s139_s12, %s219_s13  ;;  %p225_p4 = scmp.lt.s32.totalorder %s219_s13, %s219_s13 }
  0x2d   :  { %p226_p5 = por %p225_p4, %p224_p3 }
  0x2e   :  { %160 = vmatpush3.msk.msra.mxu0 %vm56_vm1, %v44_v5 }
  0x2f   :  { %162 = vmatmul.mubr.msk.f32.vlgmr.msra.gmra.mrb[0].mxu0 %vm52_vm2, %v41_v6  ;;  %p227_p6 = pnand %p226_p5, %p220_p2 }
 0x102   :  { %v126_v8 = vpop.f32.mrb[0].mxu0 }
 0x103   :  { %v127_v9 = vadd.f32 %v148_v7, %v126_v8  ;;  %v163_v10 = vpop.f32.mrb[1].mxu0 }
 0x105   :  { %131 = vst.msk [vmem:[#allocation7] sm:$0xff] %vm130_vm3, %v127_v9 }
 0x106   :  { %230 = shalt.err (!%p227_p6)
}
 0x107   :  { %s231_s16 = scalar_lea.hbm %s324_s3, 128 }
 0x108   :  { %p232_p7 = scmp.ne.s32.totalorder %s324_s3, %s231_s16  ;;  %p235_p8 = scmp.lt.u32.totalorder %s231_s16, %s324_s3 }
 0x10a   :  { %p237_p9 = pnand %p235_p8, %p232_p7 }
 0x10c   :  { %240 = shalt.err (!%p237_p9)
}
 0x10d   :  { %141 = dma.vmem_to_hbm [thread:$0]  %s139_s12, 128, %s324_s3, [#allocation4]  }
 0x10e   :  { %245 = dma.done.wait [#allocation4], 128  }
 0x10f   :  { %246 = vsyncadd [#allocation4], 4294967168 }
 0x110   :  { %145 = vsyncpa [#allocation3], 1 }
 0x111   :  { %146 = vsyncpa [#allocation6], 1 }
 0x112   :  { %147 = vsyncpa [#allocation4], 1 }

</bundles_post_ra>
